<compile_context>
chip_gen: v7x
topology: tpu7x:2x2x1
jax: 0.10.0
libtpu: 0.0.40
codegen_flags: <defaults>
</compile_context>

<pallas_src>
import math

import jax
import jax.numpy as jnp
from jax.experimental import pallas as pl
from jax.experimental.pallas import tpu as pltpu

_LANES = 128                       # vreg lane width
_SUBLANES = 8                      # f32 sublane tiling
_TILE_ROWS = 4096                  # 4096 x 128 x 4 B = 2 MiB per f32 operand per block
_VMEM_LIMIT = 32 * 1024 * 1024     # raise v5e's 16 MiB scoped default; default on v6e/v7x


def _tile_rows(rows):
    """Block height: <= _TILE_ROWS, a multiple of 8, and (whenever rows > 8) small
    enough that the grid has >= 2 steps so both v7x TensorCores share the HBM
    bandwidth. rows <= 8 uses the full extent (block == array dims is allowed)."""
    if rows <= _SUBLANES:
        return rows
    half = ((rows + 1) // 2 + _SUBLANES - 1) // _SUBLANES * _SUBLANES
    return min(_TILE_ROWS, half)


# ----------------------------------------------------------------------------- kernels
def _ema_kernel(coef_ref, ema_ref, x_ref, out_ref):
    # coef_ref (SMEM, f32[2]) = [a_eff, b_eff];  out = ema * a_eff + x * b_eff
    a = coef_ref[0]
    b = coef_ref[1]
    out_ref[...] = ema_ref[...] * a + x_ref[...].astype(jnp.float32) * b


def _ema_debias_kernel(coef_ref, ema_ref, x_ref, state_ref, debiased_ref):
    # coef_ref (SMEM, f32[3]) = [alpha, 1-alpha, 1/(1-alpha_power_new)]
    # state    = ema*alpha + x*(1-alpha)      (stored, undivided)
    # debiased = state * coef[2]              (returned copy) -- fused, one HBM pass
    a = coef_ref[0]
    b = coef_ref[1]
    inv = coef_ref[2]
    s = ema_ref[...] * a + x_ref[...].astype(jnp.float32) * b
    state_ref[...] = s
    debiased_ref[...] = s * inv


# ----------------------------------------------------------------------- pallas wrappers
def _pallas_ema(coeffs, ema_slab, x_slab):
    rows = ema_slab.shape[0]
    tr = _tile_rows(rows)
    spec = pl.BlockSpec((tr, _LANES), lambda i: (i, 0))
    return pl.pallas_call(
        _ema_kernel,
        out_shape=jax.ShapeDtypeStruct((rows, _LANES), jnp.float32),
        grid=(pl.cdiv(rows, tr),),
        in_specs=[pl.BlockSpec(memory_space=pltpu.SMEM), spec, spec],
        out_specs=spec,
        compiler_params=pltpu.CompilerParams(
            dimension_semantics=("parallel",),
            vmem_limit_bytes=_VMEM_LIMIT),
    )(coeffs, ema_slab, x_slab)


def _pallas_ema_debias(coeffs, ema_slab, x_slab):
    rows = ema_slab.shape[0]
    tr = _tile_rows(rows)
    spec = pl.BlockSpec((tr, _LANES), lambda i: (i, 0))
    out_sds = jax.ShapeDtypeStruct((rows, _LANES), jnp.float32)
    return pl.pallas_call(
        _ema_debias_kernel,
        out_shape=(out_sds, out_sds),
        grid=(pl.cdiv(rows, tr),),
        in_specs=[pl.BlockSpec(memory_space=pltpu.SMEM), spec, spec],
        out_specs=(spec, spec),
        compiler_params=pltpu.CompilerParams(
            dimension_semantics=("parallel",),
            vmem_limit_bytes=_VMEM_LIMIT),
    )(coeffs, ema_slab, x_slab)


# ------------------------------------------------------------------- jitted step programs
def _to_slab(flat, rows):
    pad = rows * _LANES - flat.shape[0]
    if pad:
        flat = jnp.pad(flat, (0, pad))
    return flat.reshape(rows, _LANES)


def _split_leaves(slab, leaves):
    flat = slab.reshape(-1)
    outs, off = [], 0
    for v in leaves:
        sz = v.size
        outs.append(flat[off:off + sz].reshape(v.shape))
        off += sz
    return tuple(outs)


@jax.jit
def _tensor_step_aligned(ema, x, ab):
    rows = ema.size // _LANES
    new_slab = _pallas_ema(ab, ema.reshape(rows, _LANES), x.reshape(rows, _LANES))
    return new_slab.reshape(ema.shape)


@jax.jit
def _tensor_step_aligned_debias(ema, x, ab, alpha_power):
    ap_new = alpha_power * ab[0]
    inv = 1.0 / (1.0 - ap_new)
    coeffs = jnp.stack([ab[0] * inv, ab[1] * inv]).astype(jnp.float32)
    rows = ema.size // _LANES
    new_slab = _pallas_ema(coeffs, ema.reshape(rows, _LANES), x.reshape(rows, _LANES))
    return new_slab.reshape(ema.shape), ap_new


@jax.jit
def _tensor_step_padded(ema_slab, x, ab):
    rows = ema_slab.shape[0]
    xf = jnp.ravel(x)
    new_slab = _pallas_ema(ab, ema_slab, _to_slab(xf, rows))
    out = new_slab.reshape(-1)[:xf.shape[0]].reshape(x.shape)
    return new_slab, out


@jax.jit
def _tensor_step_padded_debias(ema_slab, x, ab, alpha_power):
    ap_new = alpha_power * ab[0]
    inv = 1.0 / (1.0 - ap_new)
    coeffs = jnp.stack([ab[0] * inv, ab[1] * inv]).astype(jnp.float32)
    rows = ema_slab.shape[0]
    xf = jnp.ravel(x)
    new_slab = _pallas_ema(coeffs, ema_slab, _to_slab(xf, rows))
    out = new_slab.reshape(-1)[:xf.shape[0]].reshape(x.shape)
    return new_slab, out, ap_new


@jax.jit
def _dict_step(ema_slab, leaves, ab):
    rows = ema_slab.shape[0]
    xf = jnp.concatenate([jnp.ravel(v).astype(jnp.float32) for v in leaves])
    new_slab = _pallas_ema(ab, ema_slab, _to_slab(xf, rows))
    return new_slab, _split_leaves(new_slab, leaves)


@jax.jit
def _dict_step_debias(ema_slab, leaves, ab, alpha_power):
    rows = ema_slab.shape[0]
    xf = jnp.concatenate([jnp.ravel(v).astype(jnp.float32) for v in leaves])
    ap_new = alpha_power * ab[0]
    coeffs = jnp.stack([ab[0], ab[1], 1.0 / (1.0 - ap_new)]).astype(jnp.float32)
    new_slab, debiased = _pallas_ema_debias(coeffs, ema_slab, _to_slab(xf, rows))
    return new_slab, _split_leaves(debiased, leaves), ap_new


# --------------------------------------------------------------------------------- module
class ExponentialMovingAverage:
    """Functional-state JAX/Pallas port of the PyTorch module.

    Supports scalars, tensors and dicts of tensors, with optional debiasing.
    """

    def __init__(self, alpha=0.99, initial_value=0.0, debias=False):
        self.alpha = float(alpha)
        self.initial_value = float(initial_value)
        self.debias = debias
        if self.debias and self.initial_value != 0:
            raise NotImplementedError(
                "Debiasing is implemented only for initial_value==0.")
        self.ema = None            # aligned tensor: user-shaped f32; else (rows,128) slab
        self.alpha_power = 1.0     # becomes a carried device f32 scalar under debias
        self._ab = None            # device f32[2] = [alpha, 1-alpha], created once
        self._mode = None          # "tensor" | "dict"
        self._aligned = False
        self._shape = None
        self._keys = None
        self._shapes = None

    # -- helpers -------------------------------------------------------------
    def _coeffs(self):
        if self._ab is None:
            # Created once and kept on device: no per-step host->device transfer.
            self._ab = jnp.asarray([self.alpha, 1.0 - self.alpha], jnp.float32)
        return self._ab

    def _ap(self):
        # alpha_power is carried on device. We never "turn off" debias: once
        # alpha_power underflows to 0, the divisor 1/(1-0) == 1 is a no-op,
        # numerically identical to PyTorch disabling the branch.
        if not isinstance(self.alpha_power, jax.Array):
            self.alpha_power = jnp.asarray(self.alpha_power, jnp.float32)
        return self.alpha_power

    # -- forward -------------------------------------------------------------
    def __call__(self, x):
        if isinstance(x, dict):
            return self._forward_dict(x)
        return self._forward_tensor(x)

    def _forward_tensor(self, x):
        x = jnp.asarray(x)
        shape = tuple(x.shape)
        if self.ema is None:
            self._mode = "tensor"
            self._shape = shape
            n = max(int(x.size), 1)
            rows = pl.cdiv(n, _LANES)
            self._aligned = (rows * _LANES == int(x.size))
            if self._aligned:
                # Slab reshapes inside the jitted step are free bitcasts, so the
                # stored state keeps the user-facing shape (zero extra HBM passes).
                self.ema = jnp.full(shape, self.initial_value, jnp.float32)
            else:
                # Unaligned: pad the state ONCE into slab form; only x is padded
                # per step and only the returned value is sliced/reshaped.
                self.ema = jnp.full((rows, _LANES), self.initial_value, jnp.float32)
        elif self._mode != "tensor" or shape != self._shape:
            raise ValueError("input shape/type must match the first call")

        ab = self._coeffs()
        if self.debias:
            ap = self._ap()
            if self._aligned:
                out, ap_new = _tensor_step_aligned_debias(self.ema, x, ab, ap)
                self.ema = out       # stored state is debiased too (PyTorch `/=`)
            else:
                self.ema, out, ap_new = _tensor_step_padded_debias(self.ema, x, ab, ap)
            self.alpha_power = ap_new
            return out
        if self._aligned:
            out = _tensor_step_aligned(self.ema, x, ab)
            self.ema = out
            return out
        self.ema, out = _tensor_step_padded(self.ema, x, ab)
        return out

    def _forward_dict(self, x):
        if self.ema is None:
            self._mode = "dict"
            self._keys = list(x.keys())
            self._shapes = [tuple(jnp.shape(x[k])) for k in self._keys]
            n = max(sum(int(math.prod(s)) for s in self._shapes), 1)
            rows = pl.cdiv(n, _LANES)
            # All leaves live in one padded (rows,128) slab -> one pallas_call/step.
            self.ema = jnp.full((rows, _LANES), self.initial_value, jnp.float32)
        else:
            if self._mode != "dict" or len(x) != len(self._keys) or any(
                    k not in x or tuple(jnp.shape(x[k])) != s
                    for k, s in zip(self._keys, self._shapes)):
                raise ValueError("dict keys/shapes must match the first call")

        leaves = tuple(jnp.asarray(x[k]) for k in self._keys)
        ab = self._coeffs()
        if self.debias:
            # Debias division fused into the kernel (second output): stored state
            # stays undivided, returned copies are divided -- single HBM pass.
            self.ema, outs, ap_new = _dict_step_debias(self.ema, leaves, ab, self._ap())
            self.alpha_power = ap_new
        else:
            self.ema, outs = _dict_step(self.ema, leaves, ab)
        return x.__class__({k: o for k, o in zip(self._keys, outs)})


if __name__ == "__main__":
    key = jax.random.PRNGKey(0)
    k1, k2, k3, k4, k5, k6 = jax.random.split(key, 6)

    alpha = 0.99
    am1 = 1.0 - alpha

    # ---- tensor path, no debias; (2,4,16,16) = 2048 elems (lane-aligned, 2-step grid) ----
    x1 = jax.random.normal(k1, (2, 4, 16, 16), dtype=jnp.float32)
    x2 = jax.random.normal(k2, (2, 4, 16, 16), dtype=jnp.float32)
    mod = ExponentialMovingAverage(alpha=alpha, initial_value=0.0, debias=False)
    o1 = mod(x1)
    o2 = mod(x2)
    jax.block_until_ready(o2)
    r1 = jnp.zeros_like(x1) * alpha + x1 * am1
    r2 = r1 * alpha + x2 * am1
    assert o1.shape == x1.shape and o1.dtype == jnp.float32
    assert jnp.allclose(o1, r1, atol=1e-6, rtol=1e-6)
    assert jnp.allclose(o2, r2, atol=1e-6, rtol=1e-6)

    # ---- tensor path, debias, unaligned size (exercises padded slab-state path) ----
    y1 = jax.random.normal(k3, (3, 5, 7), dtype=jnp.float32)
    y2 = jax.random.normal(k4, (3, 5, 7), dtype=jnp.float32)
    mod_d = ExponentialMovingAverage(alpha=alpha, initial_value=0.0, debias=True)
    d1 = mod_d(y1)
    d2 = mod_d(y2)
    jax.block_until_ready(d2)
    ap = alpha
    s1 = jnp.zeros_like(y1) * alpha + y1 * am1
    rd1 = s1 / (1.0 - ap)
    ap *= alpha
    s2 = rd1 * alpha + y2 * am1
    rd2 = s2 / (1.0 - ap)
    assert jnp.allclose(d1, rd1, atol=1e-5, rtol=1e-4)
    assert jnp.allclose(d2, rd2, atol=1e-5, rtol=1e-4)

    # ---- dict path, debias (fused divide kernel, one pallas_call per step) ----
    xd1 = {"w": jax.random.normal(k5, (4, 8), dtype=jnp.float32),
           "b": jax.random.normal(k6, (16,), dtype=jnp.float32)}
    xd2 = {"w": xd1["w"] * 0.5 + 1.0, "b": xd1["b"] * -0.25}
    mod_dict = ExponentialMovingAverage(alpha=alpha, initial_value=0.0, debias=True)
    od1 = mod_dict(xd1)
    od2 = mod_dict(xd2)
    jax.block_until_ready(od2["w"])
    ap = 1.0
    st = {k: jnp.zeros_like(v) for k, v in xd1.items()}
    st = {k: st[k] * alpha + xd1[k] * am1 for k in st}
    ap *= alpha
    ref1 = {k: st[k] / (1.0 - ap) for k in st}
    st = {k: st[k] * alpha + xd2[k] * am1 for k in st}
    ap *= alpha
    ref2 = {k: st[k] / (1.0 - ap) for k in st}
    for k in st:
        assert od1[k].shape == xd1[k].shape
        assert jnp.allclose(od1[k], ref1[k], atol=1e-5, rtol=1e-4)
        assert jnp.allclose(od2[k], ref2[k], atol=1e-5, rtol=1e-4)

    print("KERNEL_OK")
</pallas_src>

<mosaic_0001>
module attributes {stable_mosaic.version = 11 : i64} {
  func.func @_ema_kernel(%arg0: i32, %arg1: memref<2xf32, #tpu.memory_space<smem>>, %arg2: memref<8x128xf32, #tpu.memory_space<vmem>>, %arg3: memref<8x128xf32, #tpu.memory_space<vmem>>, %arg4: memref<8x128xf32, #tpu.memory_space<vmem>>) attributes {dimension_semantics = [#tpu.dimension_semantics<parallel>], iteration_bounds = array<i64: 2>, scalar_prefetch = 0 : i64, scratch_operands = 0 : i64, tpu.core_type = #tpu.core_type<tc>, window_params = [{transform_indices = @transform_0, window_bounds = array<i64: 2>}, {transform_indices = @transform_1, window_bounds = array<i64: 8, 128>}, {transform_indices = @transform_2, window_bounds = array<i64: 8, 128>}, {transform_indices = @transform_3, window_bounds = array<i64: 8, 128>}]} {
    %c0 = arith.constant 0 : index
    %0 = memref.load %arg1[%c0] : memref<2xf32, #tpu.memory_space<smem>>
    %c1 = arith.constant 1 : index
    %1 = memref.load %arg1[%c1] : memref<2xf32, #tpu.memory_space<smem>>
    %c0_0 = arith.constant 0 : index
    %c0_1 = arith.constant 0 : index
    %2 = vector.load %arg2[%c0_0, %c0_1] : memref<8x128xf32, #tpu.memory_space<vmem>>, vector<8x128xf32>
    %3 = vector.broadcast %0 : f32 to vector<8x128xf32>
    %4 = arith.mulf %2, %3 : vector<8x128xf32>
    %c0_2 = arith.constant 0 : index
    %c0_3 = arith.constant 0 : index
    %5 = vector.load %arg3[%c0_2, %c0_3] : memref<8x128xf32, #tpu.memory_space<vmem>>, vector<8x128xf32>
    %6 = vector.broadcast %1 : f32 to vector<8x128xf32>
    %7 = arith.mulf %5, %6 : vector<8x128xf32>
    %8 = arith.addf %4, %7 : vector<8x128xf32>
    %c0_4 = arith.constant 0 : index
    %c0_5 = arith.constant 0 : index
    %9 = vector.load %arg4[%c0_4, %c0_5] : memref<8x128xf32, #tpu.memory_space<vmem>>, vector<8x128xf32>
    tpu.vector_store %arg4[%c0_4, %c0_5], %8 {strides = array<i32>} : memref<8x128xf32, #tpu.memory_space<vmem>>, vector<8x128xf32>,
    return
  }
  func.func @transform_0(%arg0: i32) -> i32 {
    %c0_i32 = arith.constant 0 : i32
    %c0_i32_0 = arith.constant 0 : i32
    return %c0_i32 : i32
  }
  func.func @transform_1(%arg0: i32) -> (i32, i32) {
    %c0_i32 = arith.constant 0 : i32
    %c0_i32_0 = arith.constant 0 : i32
    return %arg0, %c0_i32 : i32, i32
  }
  func.func @transform_2(%arg0: i32) -> (i32, i32) {
    %c0_i32 = arith.constant 0 : i32
    %c0_i32_0 = arith.constant 0 : i32
    return %arg0, %c0_i32 : i32, i32
  }
  func.func @transform_3(%arg0: i32) -> (i32, i32) {
    %c0_i32 = arith.constant 0 : i32
    %c0_i32_0 = arith.constant 0 : i32
    return %arg0, %c0_i32 : i32, i32
  }
}

</mosaic_0001>

<bundles_post_ra>
// kernel: _tensor_step_aligned.1
= control target key start
LH: loop header
LB: loop body
LE: loop exit
PB: predicated region body
PF: predicated region fallthrough
CT: control target
= control target key end

     0   :  { %8 = vsyncpa [#allocation3], 0  ;;  %s364_s12 = smov 0   ;;  %s398_s0 = inlined_call_operand.vmem [shape: f32[2], index: 0, kind: input, shape index: {}]   ;;  %s399_s1 = inlined_call_operand.vmem [shape: f32[16,128], index: 1, kind: input, shape index: {}]   ;;  %s400_s2 = inlined_call_operand.vmem [shape: f32[16,128], index: 2, kind: input, shape index: {}]   ;;  %s401_s3 = inlined_call_operand.vmem [shape: f32[16,128], index: 3, kind: output, shape index: {}]  }
   0x1 LB: > { %s284_s13 = sadd.s32 4294967295, %s341_s12   ;;  %p286_p0 = scmp.ge.s32.totalorder %s341_s12, 1  ;;  %s341_s12 = sphi %s364_s12, %s14_s12  }
   0x2   : > { %p118_p1 = scmp.lt.s32.totalorder %s341_s12, 3  ;;  %s131_s16 = sshll.u32 %s398_s0, 4  ;;  %s132_s16 = int_to_ptr.vmem [resolvable:$true] %s131_s16 }
   0x3   : > { %p305_p3 = scmp.eq.s32.totalorder %s284_s13, 0  ;;  %s316_s18 = scalar_lea.vmem %s132_s16, 16 }
   0x4   : > { %p375_p2 = pnand %p286_p0, %p118_p1  ;;  %p317_p6 = scmp.ne.s32.totalorder %s132_s16, %s316_s18 }
   0x5   : > { %p324_p10 = scmp.lt.s32.totalorder %s132_s16, %s132_s16  ;;  %p325_p11 = scmp.lt.s32.totalorder %s316_s18, %s316_s18 }
   0x6   : > { %p301_p4 = pneg %p375_p2 }
   0x7   : > { %p326_p12 = por %p325_p11, %p324_p10 }
   0x8   : > { %p302_p5 = pnand %p305_p3, %p301_p4 }
   0xa   : > { %p318_p7 = pneg %p302_p5 }
   0xc   : > { %p319_p8 = pnand %p318_p7, %p317_p6 }
   0xe   : > { %p320_p9 = pneg %p319_p8 }
  0x10   : > { %p327_p13 = pnand %p326_p12, %p320_p9 }
  0x12   : > { %330 = shalt.err (!%p327_p13)
}
  0x13   : > { %s343_s19 = smov [#allocation2]   ;;  %158 = sbr.rel (%p375_p2) target bundleno = 42 (0x2a), region = 32 }
  0x14   : > { %304 = dma.vmem_to_smem (!%p302_p5), %s132_s16, 16, %s343_s19, [#allocation3]  }
  0x1a   : > { %336 = dma.done.wait (%p305_p3), [#allocation3], 16  }
  0x1b   : > { %338 = vsyncadd (%p305_p3), [#allocation3], 4294967280 }
  0x1c   : > { %164 = sfence }
  0x1d   : > { %p185_p0 = scmp.lt.s32.totalorder %s284_s13, 1  ;;  %s197_s20 = sld [smem:[#allocation2]] }
  0x1e   : > { %s294_s21 = sld [smem:[#allocation2 + $0x1]] }
  0x1f   : > { %s404_s13 = smov (!%p185_p0, %s284_s13), 1 }
  0x20   : > { %s291_s22 = sshll.u32 %s404_s13, 3 }
  0x21   : > { %s188_s25 = scalar_lea.vmem %s399_s1, %s291_s22  ;;  %s192_s28 = scalar_lea.vmem %s400_s2, %s291_s22 }
  0x22   : > { %v199_v0 = vld [vmem:[%s188_s25] sm:$0xff]  ;;  %s196_s4 = scalar_lea.vmem %s401_s3, %s291_s22 }
  0x23   : > { %v200_v1 = vstv %s197_s20  ;;  %v202_v2 = vld [vmem:[%s192_s28] sm:$0xff] }
  0x24   : > { %v201_v3 = vmul.f32 %v200_v1, %v199_v0  ;;  %v203_v4 = vstv %s294_s21 }
  0x25   : > { %v204_v5 = vmul.f32 %v203_v4, %v202_v2 }
  0x27   : > { %v205_v6 = vadd.f32 %v204_v5, %v201_v3 }
  0x29   : > { %206 = vst [vmem:[%s196_s4] sm:$0xff] %v205_v6 }
  0x2a PF: > { %s14_s12 = sadd.s32 1, %s341_s12  }
  0x2b   : > { %p11_p1 = scmp.ge.s32.totalorder %s14_s12, 4  }
  0x2d   :  { %13 = sbr.rel (!%p11_p1) target bundleno = 1 (0x1), region = 70 }
  0x34   :  { %226 = vsyncpa [#allocation3], 1 }
  0x35   :  { %228 = vsyncpa [#allocation3 + $0x1], 1 }

</bundles_post_ra>
